<compile_context>
chip_gen: v7x
topology: tpu7x:2x2x1
jax: 0.10.0
libtpu: 0.0.40
codegen_flags: <defaults>
</compile_context>

<pallas_src>
import jax
import jax.numpy as jnp
from jax import lax
from jax.experimental import pallas as pl
from jax.experimental.pallas import tpu as pltpu


def _critic_kernel(s_ref, a_ref, w1s_ref, w1a_ref, b1_ref,
                   w2_ref, b2_ref, w3_ref, b3_ref, o_ref):
    # fc1 with the concat fused away: x @ W1 == s @ W1[:Ds] + a @ W1[Ds:]
    h1 = (jnp.dot(s_ref[...], w1s_ref[...], preferred_element_type=jnp.float32)
          + jnp.dot(a_ref[...], w1a_ref[...], preferred_element_type=jnp.float32)
          + b1_ref[...])
    h1 = jnp.maximum(h1, 0.0)                                        # (TB, 64)

    h2 = jnp.dot(h1, w2_ref[...], preferred_element_type=jnp.float32) + b2_ref[...]
    h2 = jnp.maximum(h2, 0.0)                                        # (TB, 64)

    # fc3 computed transposed: (1, 64) x (TB, 64)^T -> (1, TB) lane-dense row.
    out = lax.dot_general(w3_ref[...], h2, (((1,), (1,)), ((), ())),
                          preferred_element_type=jnp.float32)        # (1, TB)
    o_ref[...] = (out + b3_ref[0]).astype(o_ref.dtype)


def _round_up(x, m):
    return (x + m - 1) // m * m


_SPLIT_THRESHOLD = 2048  # above this, force >= 2 grid steps (v7x has 2 TCs)


def _chip_budget():
    """(max batch-tile rows, scoped VMEM limit) per TPU generation."""
    cap, vmem = 4096, 32 << 20          # conservative: v7x has 64 MiB physical VMEM
    try:
        kind = jax.devices()[0].device_kind.lower()
        if "v5" in kind or "v6" in kind:
            cap, vmem = 8192, 64 << 20  # 128 MiB VMEM parts: bigger resident tiles
    except Exception:
        pass
    return cap, vmem


def _choose_tiling(B):
    """Returns (TB, n_tiles, B_pad, vmem_limit); B_pad = n_tiles * TB >= B."""
    tb_cap, vmem_limit = _chip_budget()
    n = pl.cdiv(B, tb_cap)
    if n == 1 and B >= _SPLIT_THRESHOLD:
        n = 2                           # let v7x shard the batch over both TCs
    if n == 1:
        # Single full-batch tile: block == full array, no padding, no masking.
        return B, 1, B, vmem_limit
    tb = _round_up(pl.cdiv(B, n), 128)  # 128-aligned so (1, TB) out blocks are legal
    n = pl.cdiv(B, tb)
    return tb, n, n * tb, vmem_limit


def critic_forward(state, action, params):
    """state: (B, state_size), action: (B, action_size) -> (B, 1) float32."""
    w1_s, w1_a, b1, w2, b2, w3, b3 = params

    B, Ds = state.shape
    Da = action.shape[1]
    H = w2.shape[0]

    TB, n_tiles, B_pad, vmem_limit = _choose_tiling(B)

    full = lambda shape: pl.BlockSpec(shape, lambda i: (0,) * len(shape))

    out = pl.pallas_call(
        _critic_kernel,
        out_shape=jax.ShapeDtypeStruct((1, B_pad), jnp.float32),
        grid=(n_tiles,),
        in_specs=[
            pl.BlockSpec((TB, Ds), lambda i: (i, 0)),           # state tile
            pl.BlockSpec((TB, Da), lambda i: (i, 0)),           # action tile
            full((Ds, H)),                                      # W1[:Ds]
            full((Da, H)),                                      # W1[Ds:]
            full((1, H)),                                       # b1
            full((H, H)),                                       # W2
            full((1, H)),                                       # b2
            full((1, H)),                                       # w3 (transposed)
            pl.BlockSpec(memory_space=pltpu.MemorySpace.SMEM),  # b3 scalar (1,)
        ],
        out_specs=pl.BlockSpec((1, TB), lambda i: (0, i)),      # lane-dense slab
        compiler_params=pltpu.CompilerParams(
            dimension_semantics=("parallel",),
            vmem_limit_bytes=vmem_limit,
        ),
    )(state, action, w1_s, w1_a, b1, w2, b2, w3, b3)

    # Drop tail padding (garbage rows were never observable) and restore (B, 1).
    return out[0, :B].reshape(B, 1)


def init_critic_params(key, state_size, action_size, hidden=64):
    """Deterministic init matching nn.Linear's U(-1/sqrt(fan_in), 1/sqrt(fan_in)).

    Kernel-friendly layout: W1 pre-split along its input dim into (state,
    action) halves, w3 stored transposed as (1, hidden), b3 as a 1-D (1,).
    """
    d_in = state_size + action_size
    ks = jax.random.split(key, 6)

    def uniform(k, shape, fan_in):
        bound = 1.0 / jnp.sqrt(jnp.float32(fan_in))
        return jax.random.uniform(k, shape, jnp.float32, -bound, bound)

    w1 = uniform(ks[0], (d_in, hidden), d_in)
    b1 = uniform(ks[1], (1, hidden), d_in)
    w2 = uniform(ks[2], (hidden, hidden), hidden)
    b2 = uniform(ks[3], (1, hidden), hidden)
    w3 = uniform(ks[4], (1, hidden), hidden)   # fc3 weight, transposed
    b3 = uniform(ks[5], (1,), hidden)          # fc3 bias, 1-D scalar for SMEM

    w1_s = w1[:state_size]      # pre-split once: concat is fused in the kernel
    w1_a = w1[state_size:]
    return (w1_s, w1_a, b1, w2, b2, w3, b3)


def critic_ref(state, action, params):
    """Pure-JAX reference for verification (same math as the PyTorch module)."""
    w1_s, w1_a, b1, w2, b2, w3, b3 = params
    x = jnp.concatenate([state.astype(jnp.float32), action.astype(jnp.float32)], axis=1)
    w1 = jnp.concatenate([w1_s, w1_a], axis=0)
    h1 = jnp.maximum(x @ w1 + b1, 0.0)
    h2 = jnp.maximum(h1 @ w2 + b2, 0.0)
    return h2 @ w3.T + b3


if __name__ == "__main__":
    key = jax.random.PRNGKey(0)
    k_state, k_action, k_params, k_big = jax.random.split(key, 4)

    batch = 8
    state_size = 24
    action_size = 8

    state = jax.random.normal(k_state, (batch, state_size), jnp.float32)
    action = jax.random.normal(k_action, (batch, action_size), jnp.float32)
    params = init_critic_params(k_params, state_size, action_size)

    out = critic_forward(state, action, params)
    jax.block_until_ready(out)
    ref = critic_ref(state, action, params)
    assert out.shape == (batch, 1), out.shape
    assert jnp.allclose(out, ref, atol=1e-4, rtol=1e-4), "mismatch vs reference (small)"

    # Also exercise the multi-tile path (grid >= 2 steps, partial last tile).
    big_b = 2500
    kbs, kba = jax.random.split(k_big)
    s_big = jax.random.normal(kbs, (big_b, state_size), jnp.float32)
    a_big = jax.random.normal(kba, (big_b, action_size), jnp.float32)
    out_big = critic_forward(s_big, a_big, params)
    jax.block_until_ready(out_big)
    ref_big = critic_ref(s_big, a_big, params)
    assert out_big.shape == (big_b, 1), out_big.shape
    assert jnp.allclose(out_big, ref_big, atol=1e-3, rtol=1e-3), "mismatch vs reference (big)"

    print("KERNEL_OK")
</pallas_src>

<mosaic_0001>
module attributes {stable_mosaic.version = 11 : i64} {
  func.func @_critic_kernel(%arg0: i32, %arg1: memref<8x24xf32, #tpu.memory_space<vmem>>, %arg2: memref<8x8xf32, #tpu.memory_space<vmem>>, %arg3: memref<24x64xf32, #tpu.memory_space<vmem>>, %arg4: memref<8x64xf32, #tpu.memory_space<vmem>>, %arg5: memref<1x64xf32, #tpu.memory_space<vmem>>, %arg6: memref<64x64xf32, #tpu.memory_space<vmem>>, %arg7: memref<1x64xf32, #tpu.memory_space<vmem>>, %arg8: memref<1x64xf32, #tpu.memory_space<vmem>>, %arg9: memref<1xf32, #tpu.memory_space<smem>>, %arg10: memref<1x8xf32, #tpu.memory_space<vmem>>) attributes {dimension_semantics = [#tpu.dimension_semantics<parallel>], iteration_bounds = array<i64: 1>, scalar_prefetch = 0 : i64, scratch_operands = 0 : i64, tpu.core_type = #tpu.core_type<tc>, window_params = [{transform_indices = @transform_0, window_bounds = array<i64: 8, 24>}, {transform_indices = @transform_1, window_bounds = array<i64: 8, 8>}, {pipeline_mode = #tpu.pipeline_mode<synchronous>, transform_indices = @transform_2, window_bounds = array<i64: 24, 64>}, {pipeline_mode = #tpu.pipeline_mode<synchronous>, transform_indices = @transform_3, window_bounds = array<i64: 8, 64>}, {pipeline_mode = #tpu.pipeline_mode<synchronous>, transform_indices = @transform_4, window_bounds = array<i64: 1, 64>}, {pipeline_mode = #tpu.pipeline_mode<synchronous>, transform_indices = @transform_5, window_bounds = array<i64: 64, 64>}, {pipeline_mode = #tpu.pipeline_mode<synchronous>, transform_indices = @transform_6, window_bounds = array<i64: 1, 64>}, {pipeline_mode = #tpu.pipeline_mode<synchronous>, transform_indices = @transform_7, window_bounds = array<i64: 1, 64>}, {transform_indices = @transform_8, window_bounds = array<i64: 1>}, {transform_indices = @transform_9, window_bounds = array<i64: 1, 8>}]} {
    %c0 = arith.constant 0 : index
    %c0_0 = arith.constant 0 : index
    %0 = vector.load %arg1[%c0, %c0_0] : memref<8x24xf32, #tpu.memory_space<vmem>>, vector<8x24xf32>
    %c0_1 = arith.constant 0 : index
    %c0_2 = arith.constant 0 : index
    %1 = vector.load %arg3[%c0_1, %c0_2] : memref<24x64xf32, #tpu.memory_space<vmem>>, vector<24x64xf32>
    %cst = arith.constant dense<0.000000e+00> : vector<8x64xf32>
    %2 = tpu.matmul %0, %1, %cst {dimension_numbers = #tpu.dot_dimension_numbers<[1], [0], [0], [1], [0, 0, 1, 1], [], []>} : vector<8x24xf32>, vector<24x64xf32>, vector<8x64xf32> -> vector<8x64xf32>
    %c0_3 = arith.constant 0 : index
    %c0_4 = arith.constant 0 : index
    %3 = vector.load %arg2[%c0_3, %c0_4] : memref<8x8xf32, #tpu.memory_space<vmem>>, vector<8x8xf32>
    %c0_5 = arith.constant 0 : index
    %c0_6 = arith.constant 0 : index
    %4 = vector.load %arg4[%c0_5, %c0_6] : memref<8x64xf32, #tpu.memory_space<vmem>>, vector<8x64xf32>
    %cst_7 = arith.constant dense<0.000000e+00> : vector<8x64xf32>
    %5 = tpu.matmul %3, %4, %cst_7 {dimension_numbers = #tpu.dot_dimension_numbers<[1], [0], [0], [1], [0, 0, 1, 1], [], []>} : vector<8x8xf32>, vector<8x64xf32>, vector<8x64xf32> -> vector<8x64xf32>
    %6 = arith.addf %2, %5 : vector<8x64xf32>
    %c0_8 = arith.constant 0 : index
    %c0_9 = arith.constant 0 : index
    %7 = vector.load %arg5[%c0_8, %c0_9] : memref<1x64xf32, #tpu.memory_space<vmem>>, vector<1x64xf32>
    %8 = vector.broadcast %7 : vector<1x64xf32> to vector<8x64xf32>
    %9 = arith.addf %6, %8 : vector<8x64xf32>
    %cst_10 = arith.constant 0.000000e+00 : f32
    %10 = vector.broadcast %cst_10 : f32 to vector<8x64xf32>
    %11 = arith.maximumf %9, %10 : vector<8x64xf32>
    %c0_11 = arith.constant 0 : index
    %c0_12 = arith.constant 0 : index
    %12 = vector.load %arg6[%c0_11, %c0_12] : memref<64x64xf32, #tpu.memory_space<vmem>>, vector<64x64xf32>
    %cst_13 = arith.constant dense<0.000000e+00> : vector<8x64xf32>
    %13 = tpu.matmul %11, %12, %cst_13 {dimension_numbers = #tpu.dot_dimension_numbers<[1], [0], [0], [1], [0, 0, 1, 1], [], []>} : vector<8x64xf32>, vector<64x64xf32>, vector<8x64xf32> -> vector<8x64xf32>
    %c0_14 = arith.constant 0 : index
    %c0_15 = arith.constant 0 : index
    %14 = vector.load %arg7[%c0_14, %c0_15] : memref<1x64xf32, #tpu.memory_space<vmem>>, vector<1x64xf32>
    %15 = vector.broadcast %14 : vector<1x64xf32> to vector<8x64xf32>
    %16 = arith.addf %13, %15 : vector<8x64xf32>
    %cst_16 = arith.constant 0.000000e+00 : f32
    %17 = vector.broadcast %cst_16 : f32 to vector<8x64xf32>
    %18 = arith.maximumf %16, %17 : vector<8x64xf32>
    %c0_17 = arith.constant 0 : index
    %c0_18 = arith.constant 0 : index
    %19 = vector.load %arg8[%c0_17, %c0_18] : memref<1x64xf32, #tpu.memory_space<vmem>>, vector<1x64xf32>
    %cst_19 = arith.constant dense<0.000000e+00> : vector<1x8xf32>
    %20 = tpu.matmul %19, %18, %cst_19 {dimension_numbers = #tpu.dot_dimension_numbers<[1], [1], [0], [0], [0, 0, 1, 0], [], []>} : vector<1x64xf32>, vector<8x64xf32>, vector<1x8xf32> -> vector<1x8xf32>
    %c0_20 = arith.constant 0 : index
    %21 = memref.load %arg9[%c0_20] : memref<1xf32, #tpu.memory_space<smem>>
    %22 = vector.broadcast %21 : f32 to vector<1x8xf32>
    %23 = arith.addf %20, %22 : vector<1x8xf32>
    %c0_21 = arith.constant 0 : index
    %c0_22 = arith.constant 0 : index
    %24 = vector.load %arg10[%c0_21, %c0_22] : memref<1x8xf32, #tpu.memory_space<vmem>>, vector<1x8xf32>
    tpu.vector_store %arg10[%c0_21, %c0_22], %23 {strides = array<i32>} : memref<1x8xf32, #tpu.memory_space<vmem>>, vector<1x8xf32>,
    return
  }
  func.func @transform_0(%arg0: i32) -> (i32, i32) {
    %c0_i32 = arith.constant 0 : i32
    %c0_i32_0 = arith.constant 0 : i32
    return %arg0, %c0_i32 : i32, i32
  }
  func.func @transform_1(%arg0: i32) -> (i32, i32) {
    %c0_i32 = arith.constant 0 : i32
    %c0_i32_0 = arith.constant 0 : i32
    return %arg0, %c0_i32 : i32, i32
  }
  func.func @transform_2(%arg0: i32) -> (i32, i32) {
    %c0_i32 = arith.constant 0 : i32
    %c0_i32_0 = arith.constant 0 : i32
    %c0_i32_1 = arith.constant 0 : i32
    return %c0_i32, %c0_i32_0 : i32, i32
  }
  func.func @transform_3(%arg0: i32) -> (i32, i32) {
    %c0_i32 = arith.constant 0 : i32
    %c0_i32_0 = arith.constant 0 : i32
    %c0_i32_1 = arith.constant 0 : i32
    return %c0_i32, %c0_i32_0 : i32, i32
  }
  func.func @transform_4(%arg0: i32) -> (i32, i32) {
    %c0_i32 = arith.constant 0 : i32
    %c0_i32_0 = arith.constant 0 : i32
    %c0_i32_1 = arith.constant 0 : i32
    return %c0_i32, %c0_i32_0 : i32, i32
  }
  func.func @transform_5(%arg0: i32) -> (i32, i32) {
    %c0_i32 = arith.constant 0 : i32
    %c0_i32_0 = arith.constant 0 : i32
    %c0_i32_1 = arith.constant 0 : i32
    return %c0_i32, %c0_i32_0 : i32, i32
  }
  func.func @transform_6(%arg0: i32) -> (i32, i32) {
    %c0_i32 = arith.constant 0 : i32
    %c0_i32_0 = arith.constant 0 : i32
    %c0_i32_1 = arith.constant 0 : i32
    return %c0_i32, %c0_i32_0 : i32, i32
  }
  func.func @transform_7(%arg0: i32) -> (i32, i32) {
    %c0_i32 = arith.constant 0 : i32
    %c0_i32_0 = arith.constant 0 : i32
    %c0_i32_1 = arith.constant 0 : i32
    return %c0_i32, %c0_i32_0 : i32, i32
  }
  func.func @transform_8(%arg0: i32) -> i32 {
    %c0_i32 = arith.constant 0 : i32
    %c0_i32_0 = arith.constant 0 : i32
    return %c0_i32 : i32
  }
  func.func @transform_9(%arg0: i32) -> (i32, i32) {
    %c0_i32 = arith.constant 0 : i32
    %c0_i32_0 = arith.constant 0 : i32
    return %c0_i32, %arg0 : i32, i32
  }
}

</mosaic_0001>

<bundles_post_ra>
// kernel: tpu_custom_call.1
= control target key start
LH: loop header
LB: loop body
LE: loop exit
PB: predicated region body
PF: predicated region fallthrough
CT: control target
= control target key end

     0   :  { %15 = vsyncpa [#allocation4], 0  ;;  %s780_s0 = inlined_call_operand.hbm [shape: f32[8,24], index: 0, kind: input, shape index: {}]   ;;  %s781_s1 = inlined_call_operand.hbm [shape: f32[8,8], index: 1, kind: input, shape index: {}]   ;;  %s782_s2 = inlined_call_operand.hbm [shape: f32[24,64], index: 2, kind: input, shape index: {}]   ;;  %s783_s3 = inlined_call_operand.vmem [shape: f32[8,64], index: 3, kind: input, shape index: {}]   ;;  %s784_s4 = inlined_call_operand.vmem [shape: f32[1,64], index: 4, kind: input, shape index: {}]   ;;  %s785_s5 = inlined_call_operand.hbm [shape: f32[64,64], index: 5, kind: input, shape index: {}]   ;;  %s786_s6 = inlined_call_operand.vmem [shape: f32[1,64], index: 6, kind: input, shape index: {}]   ;;  %s787_s7 = inlined_call_operand.vmem [shape: f32[1,64], index: 7, kind: input, shape index: {}]   ;;  %s788_s8 = inlined_call_operand.<no memory space> [shape: f32[1], index: 8, kind: input, shape index: {}]   ;;  %s789_s9 = inlined_call_operand.hbm [shape: f32[1,8], index: 9, kind: output, shape index: {}]  }
   0x1   :  { %16 = vsyncpa [#allocation7], 0 }
   0x2   :  { %17 = vsyncpa [#allocation10], 0 }
   0x3   :  { %18 = vsyncpa [#allocation5], 0  ;;  %s641_s30 = smov [#allocation6]   ;;  %s642_s11 = smov [#allocation3]  }
   0x4   :  { %s35_s10 = sshll.u32 %s641_s30, 4  ;;  %s25_s12 = sshll.u32 %s642_s11, 4  ;;  %s36_s10 = int_to_ptr.vmem [resolvable:$true] %s35_s10  ;;  %s26_s12 = int_to_ptr.vmem [resolvable:$true] %s25_s12 }
   0x5   :  { %s523_s15 = scalar_lea.hbm %s781_s1, 128 }
   0x6   :  { %p524_p0 = scmp.ne.s32.totalorder %s781_s1, %s523_s15  ;;  %p527_p1 = scmp.lt.u32.totalorder %s523_s15, %s781_s1 }
   0x8   :  { %p529_p2 = pnand %p527_p1, %p524_p0 }
   0xa   :  { %532 = shalt.err (!%p529_p2)
}
   0xb   :  { %s533_s20 = scalar_lea.vmem %s36_s10, 128  ;;  %p538_p4 = scmp.lt.s32.totalorder %s36_s10, %s36_s10 }
   0xc   :  { %p534_p3 = scmp.ne.s32.totalorder %s36_s10, %s533_s20  ;;  %p539_p5 = scmp.lt.s32.totalorder %s533_s20, %s533_s20 }
   0xe   :  { %p540_p6 = por %p539_p5, %p538_p4 }
  0x10   :  { %p541_p7 = pnand %p540_p6, %p534_p3 }
  0x12   :  { %544 = shalt.err (!%p541_p7)
}
  0x13   :  { %38 = dma.hbm_to_vmem [thread:$0]  %s781_s1, 128, %s36_s10, [#allocation7]  }
  0x14   :  { %s545_s25 = scalar_lea.hbm %s780_s0, 128 }
  0x15   :  { %p546_p8 = scmp.ne.s32.totalorder %s780_s0, %s545_s25  ;;  %p549_p9 = scmp.lt.u32.totalorder %s545_s25, %s780_s0 }
  0x17   :  { %p551_p10 = pnand %p549_p9, %p546_p8 }
  0x19   :  { %554 = shalt.err (!%p551_p10)
}
  0x1a   :  { %s555_s30 = scalar_lea.vmem %s26_s12, 128  ;;  %p560_p12 = scmp.lt.s32.totalorder %s26_s12, %s26_s12 }
  0x1b   :  { %p556_p11 = scmp.ne.s32.totalorder %s26_s12, %s555_s30  ;;  %p561_p13 = scmp.lt.s32.totalorder %s555_s30, %s555_s30 }
  0x1d   :  { %p562_p0 = por %p561_p13, %p560_p12 }
  0x1f   :  { %p563_p1 = pnand %p562_p0, %p556_p11 }
  0x21   :  { %566 = shalt.err (!%p563_p1)
}
  0x22   :  { %28 = dma.hbm_to_vmem [thread:$0]  %s780_s0, 128, %s26_s12, [#allocation4]  }
  0x23   :  { %s643_s11 = smov [#allocation8]   ;;  %s567_s16 = scalar_lea.hbm %s782_s2, 384 }
  0x24   :  { %s44_s13 = sshll.u32 %s643_s11, 4  ;;  %p568_p2 = scmp.ne.s32.totalorder %s782_s2, %s567_s16  ;;  %s45_s13 = int_to_ptr.vmem [resolvable:$true] %s44_s13 }
  0x25   :  { %p571_p3 = scmp.lt.u32.totalorder %s567_s16, %s782_s2 }
  0x27   :  { %p573_p4 = pnand %p571_p3, %p568_p2 }
  0x29   :  { %576 = shalt.err (!%p573_p4)
}
  0x2a   :  { %s577_s21 = scalar_lea.vmem %s45_s13, 384  ;;  %p582_p6 = scmp.lt.s32.totalorder %s45_s13, %s45_s13 }
  0x2b   :  { %p578_p5 = scmp.ne.s32.totalorder %s45_s13, %s577_s21  ;;  %p583_p7 = scmp.lt.s32.totalorder %s577_s21, %s577_s21 }
  0x2d   :  { %p584_p8 = por %p583_p7, %p582_p6 }
  0x2f   :  { %p585_p9 = pnand %p584_p8, %p578_p5 }
  0x31   :  { %588 = shalt.err (!%p585_p9)
}
  0x32   :  { %s644_s0 = smov 128   ;;  %s645_s12 = smov 8  }
  0x33   :  { %50 = dma.hbm_to_vmem [thread:$0]  %s782_s2, 384, %s45_s13, [#allocation7], %s644_s0, %s644_s0, %s645_s12  }
  0x34   :  { %s646_s24 = smov [#allocation9]   ;;  %s589_s28 = scalar_lea.hbm %s785_s5, 1024 }
  0x35   :  { %s60_s25 = sshll.u32 %s646_s24, 4  ;;  %p590_p10 = scmp.ne.s32.totalorder %s785_s5, %s589_s28  ;;  %s61_s25 = int_to_ptr.vmem [resolvable:$true] %s60_s25 }
  0x36   :  { %p593_p11 = scmp.lt.u32.totalorder %s589_s28, %s785_s5 }
  0x38   :  { %p595_p12 = pnand %p593_p11, %p590_p10 }
  0x3a   :  { %598 = shalt.err (!%p595_p12)
}
  0x3b   :  { %s599_s11 = scalar_lea.vmem %s61_s25, 1024  ;;  %p604_p0 = scmp.lt.s32.totalorder %s61_s25, %s61_s25 }
  0x3c   :  { %p600_p13 = scmp.ne.s32.totalorder %s61_s25, %s599_s11  ;;  %p605_p1 = scmp.lt.s32.totalorder %s599_s11, %s599_s11 }
  0x3e   :  { %p606_p2 = por %p605_p1, %p604_p0 }
  0x40   :  { %p607_p3 = pnand %p606_p2, %p600_p13 }
  0x42   :  { %610 = shalt.err (!%p607_p3)
}
  0x43   :  { %66 = dma.hbm_to_vmem [thread:$0]  %s785_s5, 1024, %s61_s25, [#allocation10], %s644_s0, %s644_s0, %s645_s12  }
  0x44   :  { %633 = dma.done.wait [#allocation4], 128  }
  0x45   :  { %634 = vsyncadd [#allocation4], 4294967168 }
  0x46   :  { %635 = dma.done.wait [#allocation7], 512  }
  0x47   :  { %636 = vsyncadd [#allocation7], 4294966784 }
  0x48   :  { %637 = dma.done.wait [#allocation10], 1024  }
  0x49   :  { %638 = vsyncadd [#allocation10], 4294966272  ;;  %v647_v0 = vmov 0.0   ;;  %vm648_vm0 = vmmov 0   ;;  %v649_v1 = vmov 0.0|0.0   ;;  %vm91_vm1 = vcmask 64512  }
  0x4a   :  { %460 = vmatprep.subr.mxu1 %v647_v0  ;;  %462 = vmatprep.mubr.msk.f32.mxu1 %vm648_vm0, %v647_v0  ;;  %v90_v2 = vld [vmem:[%s783_s3] sm:$0xff]  ;;  %v89_v3 = vld [vmem:[#allocation6] sm:$0xff]  ;;  %v86_v4 = vld [vmem:[#allocation8] sm:$0xff]  ;;  %vm165_vm2 = vcmask 195584   ;;  %vm263_vm3 = vcmask 523264   ;;  %v340_v35 = vstv %s788_s8  ;;  %s650_s21 = smov [#allocation11]  }
  0x4b   :  { %501 = vmatprep.subr.bf16.mxu0 %v649_v1  ;;  %490 = vmatprep.mubr.msk.f32.mxu0 %vm648_vm0, %v647_v0  ;;  %v87_v5 = vld [vmem:[#allocation8 + $0x8] sm:$0xff]  ;;  %v248_v7 = vld [vmem:[#allocation9] sm:$0xff]  ;;  %v249_v8 = vld [vmem:[#allocation9 + $0x8] sm:$0xff]  ;;  %s425_s0 = sshll.u32 %s650_s21, 4  ;;  %vm417_vm4 = vcmask 57344   ;;  %s426_s0 = int_to_ptr.vmem [resolvable:$true] %s425_s0 }
  0x4c   :  { %461 = vmatpush3.msra.mxu1 %v90_v2  ;;  %v499_v6 = vpack.c.bf16 %v87_v5, %v86_v4  ;;  %v502_v9 = vpack.c.bf16 %v249_v8, %v248_v7  ;;  %v88_v10 = vld [vmem:[#allocation8 + $0x10] sm:$0xff]  ;;  %v250_v12 = vld [vmem:[#allocation9 + $0x10] sm:$0xff]  ;;  %v252_v15 = vld [vmem:[#allocation9 + $0x20] sm:$0xff]  ;;  %s615_s12 = scalar_lea.vmem %s426_s0, 32  ;;  %p616_p5 = scmp.lt.s32.totalorder %s426_s0, %s426_s0 }
  0x4d   :  { %463 = vmatmul.mubr.msk.f32.vlgmr.msra.gmra.mrb[0].mxu1 %vm91_vm1, %v89_v3  ;;  %498 = vmatprep.subr.bf16.mxu1 %v649_v1  ;;  %v85_v11 = vld [vmem:[#allocation3] sm:$0xff]  ;;  %v253_v16 = vld [vmem:[#allocation9 + $0x28] sm:$0xff]  ;;  %v254_v18 = vld [vmem:[#allocation9 + $0x30] sm:$0xff] }
  0x4e   :  { %471 = vmatprep.mubr.msk.f32.mxu1 %vm648_vm0, %v647_v0  ;;  %500 = vmatpush3.bf16.msra.mxu1 %v499_v6  ;;  %v251_v13 = vld [vmem:[#allocation9 + $0x18] sm:$0xff]  ;;  %v508_v17 = vpack.c.bf16 %v253_v16, %v252_v15 }
  0x4f   :  { %469 = vmatprep.subr.mxu1 %v647_v0  ;;  %503 = vmatpush3.bf16.msra.mxu0 %v502_v9  ;;  %v505_v14 = vpack.c.bf16 %v251_v13, %v250_v12  ;;  %v255_v19 = vld [vmem:[#allocation9 + $0x38] sm:$0xff] }
  0x50   :  { %504 = vmatprep.subr.bf16.mxu0 %v649_v1  ;;  %v511_v20 = vpack.c.bf16 %v255_v19, %v254_v18  ;;  %v438_v24 = vld [vmem:[%s784_s4] ss:$0 sm:$0xff] }
  0x51   :  { %v439_v29 = vld [vmem:[%s786_s6] ss:$0 sm:$0xff]  ;;  %s611_s6 = scalar_lea.vmem %s426_s0, 16 }
  0x52   :  { %470 = vmatpush3.msra.mxu1 %v88_v10  ;;  %v338_v34 = vld [vmem:[%s787_s7] sm:$0x1]  ;;  %p612_p4 = scmp.ne.s32.totalorder %s426_s0, %s611_s6  ;;  %p617_p6 = scmp.lt.s32.totalorder %s615_s12, %s611_s6 }
  0x53   :  { %472 = vmatmul.mubr.msk.f32.vlgmr.msra.gmra.mrb[2].mxu1 %vm165_vm2, %v85_v11  ;;  %493 = vmatprep.subr.mxu1 %v647_v0 }
  0x54   :  { %495 = vmatprep.mubr.msk.f32.mxu1 %vm648_vm0, %v647_v0  ;;  %506 = vmatpush3.bf16.msra.mxu0 %v505_v14  ;;  %p618_p7 = por %p617_p6, %p616_p5 }
  0x55   :  { %507 = vmatprep.subr.bf16.mxu0 %v649_v1 }
  0x56   :  { %p619_p8 = pnand %p618_p7, %p612_p4 }
  0x58   :  { %509 = vmatpush3.bf16.msra.mxu0 %v508_v17 }
  0x59   :  { %510 = vmatprep.subr.bf16.mxu0 %v649_v1 }
  0x5c   :  { %512 = vmatpush3.bf16.msra.mxu0 %v511_v20 }
 0x120   :  { %v161_v21 = vpop.f32.mrb[0].mxu1 }
 0x121   :  { %v464_v22 = vpop.f32.mrb[1].mxu1 }
 0x126   :  { %v235_v23 = vpop.f32.mrb[2].mxu1 }
 0x127   :  { %v236_v25 = vadd.f32 %v235_v23, %v161_v21  ;;  %v473_v26 = vpop.f32.mrb[3].mxu1 }
 0x129   :  { %v246_v27 = vadd.f32 %v438_v24, %v236_v25 }
 0x12b   :  { %v247_v28 = vmax.f32 %v246_v27, 0.0 }
 0x12d   :  { %491 = vmatmul.mubr.msk.f32.vlgmr.msra.gmra.mrb[0].mxu0 %vm263_vm3, %v247_v28 }
 0x200   :  { %v333_v30 = vpop.f32.mrb[0].mxu0 }
 0x201   :  { %v334_v31 = vadd.f32 %v439_v29, %v333_v30  ;;  %v492_v32 = vpop.f32.mrb[1].mxu0 }
 0x203   :  { %v337_v33 = vmax.f32 %v334_v31, 0.0 }
 0x205   :  { %494 = vmatpush3.xpose.msk.msra.mxu1 %vm263_vm3, %v337_v33 }
 0x208   :  { %496 = vmatmul.mubr.msk.f32.vlgmr.msra.gmra.mrb[4].mxu1 %vm263_vm3, %v338_v34 }
 0x2db   :  { %v413_v36 = vpop.f32.mrb[4].mxu1 }
 0x2dc   :  { %v414_v37 = vadd.f32 %v413_v36, %v340_v35  ;;  %v497_v38 = vpop.f32.mrb[5].mxu1 }
 0x2de   :  { %418 = vst.msk [vmem:[#allocation11] sm:$0x1] %vm417_vm4, %v414_v37 }
 0x2df   :  { %622 = shalt.err (!%p619_p8)
}
 0x2e0   :  { %s623_s8 = scalar_lea.hbm %s789_s9, 16 }
 0x2e1   :  { %p624_p9 = scmp.ne.s32.totalorder %s789_s9, %s623_s8  ;;  %p627_p10 = scmp.lt.u32.totalorder %s623_s8, %s789_s9 }
 0x2e3   :  { %p629_p11 = pnand %p627_p10, %p624_p9 }
 0x2e5   :  { %632 = shalt.err (!%p629_p11)
}
 0x2e6   :  { %428 = dma.vmem_to_hbm [thread:$0]  %s426_s0, 16, %s789_s9, [#allocation5]  }
 0x2e7   :  { %639 = dma.done.wait [#allocation5], 16  }
 0x2e8   :  { %640 = vsyncadd [#allocation5], 4294967280 }
 0x2e9   :  { %432 = vsyncpa [#allocation4], 1 }
 0x2ea   :  { %433 = vsyncpa [#allocation7], 1 }
 0x2eb   :  { %434 = vsyncpa [#allocation10], 1 }
 0x2ec   :  { %435 = vsyncpa [#allocation5], 1 }

</bundles_post_ra>
